<compile_context>
chip_gen: v7x
topology: tpu7x:2x2x1
jax: 0.10.0
libtpu: 0.0.40
codegen_flags: <defaults>
</compile_context>

<pallas_src>
import functools

import numpy as np
import jax
import jax.numpy as jnp
from jax.experimental import pallas as pl
from jax.experimental.pallas import tpu as pltpu


# ---------------- Kernel 1: batched MLP over all (graph, node) rows ------------

def mlp_kernel(x_ref, w1_ref, b1_ref, w2_ref, b2_ref, w3_ref, b3_ref, t_ref):
    x = x_ref[...]                                                     # [TM, Din]
    h = jnp.dot(x, w1_ref[...], preferred_element_type=jnp.float32) + b1_ref[...]
    h = jnp.maximum(h, 0.0)
    h = jnp.dot(h, w2_ref[...], preferred_element_type=jnp.float32) + b2_ref[...]
    h = jnp.maximum(h, 0.0)
    t_ref[...] = (jnp.dot(h, w3_ref[...], preferred_element_type=jnp.float32)
                  + b3_ref[...])                                       # [TM, Dout]


def mlp_forward(x_flat, params, *, tm_max=1024):
    """x_flat: [M, Din] -> t: [M, Dout].  One batched MLP pass for all rows."""
    M, Din = x_flat.shape
    w1, b1, w2, b2, w3, b3 = params
    H = w1.shape[1]
    Dout = w3.shape[1]
    # Bounded tile: never a single giant un-pipelined block for large M.
    TM = min(tm_max, M)                      # M is a multiple of 16 by construction
    M_pad = ((M + TM - 1) // TM) * TM
    if M_pad != M:
        x_flat = jnp.pad(x_flat, ((0, M_pad - M), (0, 0)))
    out = pl.pallas_call(
        mlp_kernel,
        out_shape=jax.ShapeDtypeStruct((M_pad, Dout), jnp.float32),
        grid_spec=pltpu.PrefetchScalarGridSpec(
            num_scalar_prefetch=0,
            grid=(M_pad // TM,),
            in_specs=[
                pl.BlockSpec((TM, Din), lambda m: (m, 0)),
                pl.BlockSpec((Din, H), lambda m: (0, 0)),
                pl.BlockSpec((1, H), lambda m: (0, 0)),
                pl.BlockSpec((H, H), lambda m: (0, 0)),
                pl.BlockSpec((1, H), lambda m: (0, 0)),
                pl.BlockSpec((H, Dout), lambda m: (0, 0)),
                pl.BlockSpec((1, Dout), lambda m: (0, 0)),
            ],
            out_specs=pl.BlockSpec((TM, Dout), lambda m: (m, 0)),
        ),
        compiler_params=pltpu.CompilerParams(
            dimension_semantics=("parallel",)),
    )(x_flat, w1, b1, w2, b2, w3, b3)
    return out[:M]


# ---------------- Kernel 2: pairwise broadcast-add, lane-dense bf16 output -----

def pairwise_kernel(counts_ref, t_ref, tflat_ref, out_ref, *, ti, dout, n_i):
    g = pl.program_id(0)            # flattened (graph, row-tile) index
    b = g // n_i
    i = g - b * n_i
    row_valid = (i * ti) < counts_ref[b]

    @pl.when(row_valid)
    def _():
        t_rows = t_ref[0]           # [TI, Dout]   f32, rows i*TI .. i*TI+TI-1
        t_cols = tflat_ref[0]       # [1, N*Dout]  f32, t flattened along lanes
        nd = t_cols.shape[-1]
        # 0/1 selection pattern built in-registers from iota (no HBM input, no
        # pipeline buffers): (t_rows @ sel)[r, j*Dout + d] == t_rows[r, d].
        # The MXU is otherwise idle, so the lane-tiling rides there for free.
        d_idx = jax.lax.broadcasted_iota(jnp.int32, (dout, nd), 0)
        l_idx = jax.lax.broadcasted_iota(jnp.int32, (dout, nd), 1)
        if (dout & (dout - 1)) == 0:
            lane_mod = jnp.bitwise_and(l_idx, dout - 1)
        else:
            lane_mod = l_idx % dout
        sel = (lane_mod == d_idx).astype(jnp.float32)
        tiled = jnp.dot(t_rows, sel, preferred_element_type=jnp.float32)
        # out[r, j*Dout + d] = t[i*TI + r, d] + t[j, d]; f32 add, bf16 store.
        out_ref[0] = (tiled + t_cols).astype(out_ref.dtype)

    @pl.when(jnp.logical_not(row_valid))
    def _():
        # Fully-padded row tile: the block is written back regardless, so write
        # deterministic zeros instead of stale pipeline-buffer contents.
        out_ref[...] = jnp.zeros_like(out_ref)


def _vmem_cap_bytes():
    try:
        return int(pltpu.get_tpu_info().vmem_capacity_bytes)
    except Exception:
        return 64 << 20            # conservative (v7x per-TC VMEM)


def _pick_ti(N, Dout, out_elem_bytes, budget_bytes=4 << 20):
    """Largest 16-aligned row tile dividing N whose out block fits the budget."""
    best = 16
    for cand in range(16, N + 1, 16):
        if N % cand == 0 and cand * N * Dout * out_elem_bytes <= budget_bytes:
            best = cand
    return best


def pairwise_rpe(t_bnd, t_flat, counts_dev, *, ti, out_dtype=jnp.bfloat16):
    """t_bnd: [B, N, Dout], t_flat: [B, 1, N*Dout] -> rpe2d: [B, N, N*Dout]."""
    B, N, Dout = t_bnd.shape
    nd = N * Dout
    n_i = N // ti
    out_elem = np.dtype(out_dtype).itemsize

    # VMEM budget: double-buffered in/out blocks + headroom, capped at 75% of
    # the physical per-TensorCore VMEM (no double-count of the 2x factor).
    out_block = ti * nd * out_elem
    in_block = ti * Dout * 4 + nd * 4
    vmem_limit = min(int(_vmem_cap_bytes() * 0.75),
                     max(4 << 20, 2 * (out_block + in_block) + (2 << 20)))

    flops = 2 * B * N * Dout * nd + B * N * nd           # sel matmul + add
    bytes_accessed = (B * N * nd * out_elem              # dense output store
                      + B * N * Dout * 4 + B * nd * 4)   # t + t_flat reads

    kernel = functools.partial(pairwise_kernel, ti=ti, dout=Dout, n_i=n_i)
    return pl.pallas_call(
        kernel,
        out_shape=jax.ShapeDtypeStruct((B, N, nd), out_dtype),
        grid_spec=pltpu.PrefetchScalarGridSpec(
            num_scalar_prefetch=1,                        # per-graph node counts -> SMEM
            grid=(B * n_i,),                              # one big parallel axis (megacore)
            in_specs=[
                pl.BlockSpec((1, ti, Dout),
                             lambda g, counts: (g // n_i, g % n_i, 0)),
                pl.BlockSpec((1, 1, nd),
                             lambda g, counts: (g // n_i, 0, 0)),
            ],
            out_specs=pl.BlockSpec((1, ti, nd),
                                   lambda g, counts: (g // n_i, g % n_i, 0)),
        ),
        compiler_params=pltpu.CompilerParams(
            dimension_semantics=("parallel",),
            vmem_limit_bytes=vmem_limit),
        cost_estimate=pl.CostEstimate(flops=flops, transcendentals=0,
                                      bytes_accessed=bytes_accessed),
    )(counts_dev, t_bnd, t_flat)


# ---------------- glue (to_dense_batch / from_dense_adj equivalents) -----------

def gather_valid_pairs(rpe_dense, counts):
    """from_dense_adj: keep (b, i, j) with i < n_b and j < n_b (device gather)."""
    B, N, _, D = rpe_dense.shape
    idx = np.arange(N)
    valid = ((idx[None, :, None] < counts[:, None, None]) &
             (idx[None, None, :] < counts[:, None, None]))              # [B, N, N]
    flat_idx = np.flatnonzero(valid.reshape(-1)).astype(np.int32)       # static size
    return jnp.take(rpe_dense.reshape(B * N * N, D), jnp.asarray(flat_idx), axis=0)


def deepsets_ape_forward(pestat, batch_np, num_graphs, params, *, ti=None,
                         out_dtype=jnp.bfloat16):
    """Full DeepSetsAPEEncoder forward.  Returns (rpe_flat, counts)."""
    w1, b1, w2, b2, w3, b3 = params
    Din = w1.shape[0]
    Dout = w3.shape[1]

    # to_dense_batch (N padded up to a multiple of 16 for bf16 sublane tiles).
    batch_np = np.asarray(batch_np)
    counts = np.bincount(batch_np, minlength=num_graphs)
    n_max = int(counts.max())
    N = ((n_max + 15) // 16) * 16
    B = num_graphs
    pos = np.concatenate([np.arange(c) for c in counts]).astype(np.int32)
    ape_dense = jnp.zeros((B, N, Din), jnp.float32)
    ape_dense = ape_dense.at[jnp.asarray(batch_np), jnp.asarray(pos)].set(pestat)

    # Kernel 1: MLP over all B*N rows at once (f32 weights/activations).
    t_all = mlp_forward(ape_dense.reshape(B * N, Din), params)          # [B*N, Dout]
    t_bnd = t_all.reshape(B, N, Dout)            # row view       (free XLA reshape)
    t_flat = t_all.reshape(B, 1, N * Dout)       # lane-flattened (free XLA reshape)

    if ti is None:
        ti = _pick_ti(N, Dout, np.dtype(out_dtype).itemsize)
    counts_dev = jnp.asarray(counts, jnp.int32)

    # Kernel 2: pairwise broadcast-add, lane-dense [B, N, N*Dout] bf16 output.
    rpe2d = pairwise_rpe(t_bnd, t_flat, counts_dev, ti=ti, out_dtype=out_dtype)
    rpe_dense = rpe2d.reshape(B, N, N, Dout)     # same row-major layout -> free

    # from_dense_adj: device gather of the valid (i, j) pairs (stays bf16).
    rpe_flat = gather_valid_pairs(rpe_dense, counts)
    return rpe_flat, counts


# ---------------- reference (pure JAX, f32) -------------------------------------

def reference_forward(pestat, batch_np, num_graphs, params):
    w1, b1, w2, b2, w3, b3 = params
    batch_np = np.asarray(batch_np)
    counts = np.bincount(batch_np, minlength=num_graphs)
    n_max = int(counts.max())
    N = ((n_max + 15) // 16) * 16
    B = num_graphs
    pos = np.concatenate([np.arange(c) for c in counts]).astype(np.int32)
    ape_dense = jnp.zeros((B, N, w1.shape[0]), jnp.float32)
    ape_dense = ape_dense.at[jnp.asarray(batch_np), jnp.asarray(pos)].set(pestat)
    h = jnp.maximum(ape_dense @ w1 + b1, 0.0)
    h = jnp.maximum(h @ w2 + b2, 0.0)
    t = h @ w3 + b3
    rpe = t[:, :, None, :] + t[:, None, :, :]
    return gather_valid_pairs(rpe, counts)


if __name__ == "__main__":
    key = jax.random.PRNGKey(0)
    k_x, k1, k2, k3, k4, k5, k6 = jax.random.split(key, 7)

    # 2 graphs with 5 and 16 nodes -> N = 16.  Graph 0's padded rows are masked
    # away by the gather; its fully-padded column region is computed but dropped.
    batch = np.array([0] * 5 + [1] * 16, dtype=np.int32)
    num_graphs = 2
    D_in, H, D_out = 16, 32, 16

    pestat = jax.random.normal(k_x, (batch.shape[0], D_in), dtype=jnp.float32)
    params = (
        jax.random.normal(k1, (D_in, H), dtype=jnp.float32) * 0.1,
        jax.random.normal(k2, (1, H), dtype=jnp.float32) * 0.1,
        jax.random.normal(k3, (H, H), dtype=jnp.float32) * 0.1,
        jax.random.normal(k4, (1, H), dtype=jnp.float32) * 0.1,
        jax.random.normal(k5, (H, D_out), dtype=jnp.float32) * 0.1,
        jax.random.normal(k6, (1, D_out), dtype=jnp.float32) * 0.1,
    )

    rpe_flat, counts = deepsets_ape_forward(pestat, batch, num_graphs, params)
    rpe_flat = jax.block_until_ready(rpe_flat)

    ref_flat = jax.block_until_ready(
        reference_forward(pestat, batch, num_graphs, params))

    assert rpe_flat.shape == (int((counts ** 2).sum()), D_out), rpe_flat.shape
    # Output is stored as bf16 (compute stays f32); relax tolerance accordingly.
    got = np.asarray(rpe_flat.astype(jnp.float32))
    np.testing.assert_allclose(got, np.asarray(ref_flat), rtol=1e-2, atol=1e-3)
    print("KERNEL_OK")
</pallas_src>

<mosaic_0001>
module attributes {stable_mosaic.version = 11 : i64} {
  func.func @mlp_kernel(%arg0: i32, %arg1: memref<32x16xf32, #tpu.memory_space<vmem>>, %arg2: memref<16x32xf32, #tpu.memory_space<vmem>>, %arg3: memref<1x32xf32, #tpu.memory_space<vmem>>, %arg4: memref<32x32xf32, #tpu.memory_space<vmem>>, %arg5: memref<1x32xf32, #tpu.memory_space<vmem>>, %arg6: memref<32x16xf32, #tpu.memory_space<vmem>>, %arg7: memref<1x16xf32, #tpu.memory_space<vmem>>, %arg8: memref<32x16xf32, #tpu.memory_space<vmem>>) attributes {dimension_semantics = [#tpu.dimension_semantics<parallel>], iteration_bounds = array<i64: 1>, scalar_prefetch = 0 : i64, scratch_operands = 0 : i64, tpu.core_type = #tpu.core_type<tc>, window_params = [{transform_indices = @transform_0, window_bounds = array<i64: 32, 16>}, {pipeline_mode = #tpu.pipeline_mode<synchronous>, transform_indices = @transform_1, window_bounds = array<i64: 16, 32>}, {pipeline_mode = #tpu.pipeline_mode<synchronous>, transform_indices = @transform_2, window_bounds = array<i64: 1, 32>}, {pipeline_mode = #tpu.pipeline_mode<synchronous>, transform_indices = @transform_3, window_bounds = array<i64: 32, 32>}, {pipeline_mode = #tpu.pipeline_mode<synchronous>, transform_indices = @transform_4, window_bounds = array<i64: 1, 32>}, {pipeline_mode = #tpu.pipeline_mode<synchronous>, transform_indices = @transform_5, window_bounds = array<i64: 32, 16>}, {pipeline_mode = #tpu.pipeline_mode<synchronous>, transform_indices = @transform_6, window_bounds = array<i64: 1, 16>}, {transform_indices = @transform_7, window_bounds = array<i64: 32, 16>}]} {
    %c0 = arith.constant 0 : index
    %c0_0 = arith.constant 0 : index
    %0 = vector.load %arg1[%c0, %c0_0] : memref<32x16xf32, #tpu.memory_space<vmem>>, vector<32x16xf32>
    %c0_1 = arith.constant 0 : index
    %c0_2 = arith.constant 0 : index
    %1 = vector.load %arg2[%c0_1, %c0_2] : memref<16x32xf32, #tpu.memory_space<vmem>>, vector<16x32xf32>
    %cst = arith.constant dense<0.000000e+00> : vector<32x32xf32>
    %2 = tpu.matmul %0, %1, %cst {dimension_numbers = #tpu.dot_dimension_numbers<[1], [0], [0], [1], [0, 0, 1, 1], [], []>} : vector<32x16xf32>, vector<16x32xf32>, vector<32x32xf32> -> vector<32x32xf32>
    %c0_3 = arith.constant 0 : index
    %c0_4 = arith.constant 0 : index
    %3 = vector.load %arg3[%c0_3, %c0_4] : memref<1x32xf32, #tpu.memory_space<vmem>>, vector<1x32xf32>
    %4 = vector.broadcast %3 : vector<1x32xf32> to vector<32x32xf32>
    %5 = arith.addf %2, %4 : vector<32x32xf32>
    %cst_5 = arith.constant 0.000000e+00 : f32
    %6 = vector.broadcast %cst_5 : f32 to vector<32x32xf32>
    %7 = arith.maximumf %5, %6 : vector<32x32xf32>
    %c0_6 = arith.constant 0 : index
    %c0_7 = arith.constant 0 : index
    %8 = vector.load %arg4[%c0_6, %c0_7] : memref<32x32xf32, #tpu.memory_space<vmem>>, vector<32x32xf32>
    %cst_8 = arith.constant dense<0.000000e+00> : vector<32x32xf32>
    %9 = tpu.matmul %7, %8, %cst_8 {dimension_numbers = #tpu.dot_dimension_numbers<[1], [0], [0], [1], [0, 0, 1, 1], [], []>} : vector<32x32xf32>, vector<32x32xf32>, vector<32x32xf32> -> vector<32x32xf32>
    %c0_9 = arith.constant 0 : index
    %c0_10 = arith.constant 0 : index
    %10 = vector.load %arg5[%c0_9, %c0_10] : memref<1x32xf32, #tpu.memory_space<vmem>>, vector<1x32xf32>
    %11 = vector.broadcast %10 : vector<1x32xf32> to vector<32x32xf32>
    %12 = arith.addf %9, %11 : vector<32x32xf32>
    %cst_11 = arith.constant 0.000000e+00 : f32
    %13 = vector.broadcast %cst_11 : f32 to vector<32x32xf32>
    %14 = arith.maximumf %12, %13 : vector<32x32xf32>
    %c0_12 = arith.constant 0 : index
    %c0_13 = arith.constant 0 : index
    %15 = vector.load %arg6[%c0_12, %c0_13] : memref<32x16xf32, #tpu.memory_space<vmem>>, vector<32x16xf32>
    %cst_14 = arith.constant dense<0.000000e+00> : vector<32x16xf32>
    %16 = tpu.matmul %14, %15, %cst_14 {dimension_numbers = #tpu.dot_dimension_numbers<[1], [0], [0], [1], [0, 0, 1, 1], [], []>} : vector<32x32xf32>, vector<32x16xf32>, vector<32x16xf32> -> vector<32x16xf32>
    %c0_15 = arith.constant 0 : index
    %c0_16 = arith.constant 0 : index
    %17 = vector.load %arg7[%c0_15, %c0_16] : memref<1x16xf32, #tpu.memory_space<vmem>>, vector<1x16xf32>
    %18 = vector.broadcast %17 : vector<1x16xf32> to vector<32x16xf32>
    %19 = arith.addf %16, %18 : vector<32x16xf32>
    %c0_17 = arith.constant 0 : index
    %c0_18 = arith.constant 0 : index
    %20 = vector.load %arg8[%c0_17, %c0_18] : memref<32x16xf32, #tpu.memory_space<vmem>>, vector<32x16xf32>
    tpu.vector_store %arg8[%c0_17, %c0_18], %19 {strides = array<i32>} : memref<32x16xf32, #tpu.memory_space<vmem>>, vector<32x16xf32>,
    return
  }
  func.func @transform_0(%arg0: i32) -> (i32, i32) {
    %c0_i32 = arith.constant 0 : i32
    %c0_i32_0 = arith.constant 0 : i32
    return %arg0, %c0_i32 : i32, i32
  }
  func.func @transform_1(%arg0: i32) -> (i32, i32) {
    %c0_i32 = arith.constant 0 : i32
    %c0_i32_0 = arith.constant 0 : i32
    %c0_i32_1 = arith.constant 0 : i32
    return %c0_i32, %c0_i32_0 : i32, i32
  }
  func.func @transform_2(%arg0: i32) -> (i32, i32) {
    %c0_i32 = arith.constant 0 : i32
    %c0_i32_0 = arith.constant 0 : i32
    %c0_i32_1 = arith.constant 0 : i32
    return %c0_i32, %c0_i32_0 : i32, i32
  }
  func.func @transform_3(%arg0: i32) -> (i32, i32) {
    %c0_i32 = arith.constant 0 : i32
    %c0_i32_0 = arith.constant 0 : i32
    %c0_i32_1 = arith.constant 0 : i32
    return %c0_i32, %c0_i32_0 : i32, i32
  }
  func.func @transform_4(%arg0: i32) -> (i32, i32) {
    %c0_i32 = arith.constant 0 : i32
    %c0_i32_0 = arith.constant 0 : i32
    %c0_i32_1 = arith.constant 0 : i32
    return %c0_i32, %c0_i32_0 : i32, i32
  }
  func.func @transform_5(%arg0: i32) -> (i32, i32) {
    %c0_i32 = arith.constant 0 : i32
    %c0_i32_0 = arith.constant 0 : i32
    %c0_i32_1 = arith.constant 0 : i32
    return %c0_i32, %c0_i32_0 : i32, i32
  }
  func.func @transform_6(%arg0: i32) -> (i32, i32) {
    %c0_i32 = arith.constant 0 : i32
    %c0_i32_0 = arith.constant 0 : i32
    %c0_i32_1 = arith.constant 0 : i32
    return %c0_i32, %c0_i32_0 : i32, i32
  }
  func.func @transform_7(%arg0: i32) -> (i32, i32) {
    %c0_i32 = arith.constant 0 : i32
    %c0_i32_0 = arith.constant 0 : i32
    return %arg0, %c0_i32 : i32, i32
  }
}

</mosaic_0001>

<bundles_post_ra>
// kernel: tpu_custom_call.1
= control target key start
LH: loop header
LB: loop body
LE: loop exit
PB: predicated region body
PF: predicated region fallthrough
CT: control target
= control target key end

     0   :  { %vm39_vm0 = vcmask 130048   ;;  %vm152_vm1 = vcmask 261120   ;;  %s584_s1 = inlined_call_operand.vmem [shape: f32[16,32], index: 1, kind: input, shape index: {}]   ;;  %s585_s0 = inlined_call_operand.vmem [shape: f32[32,16], index: 0, kind: input, shape index: {}]   ;;  %s586_s3 = inlined_call_operand.vmem [shape: f32[32,32], index: 3, kind: input, shape index: {}]   ;;  %s587_s5 = inlined_call_operand.vmem [shape: f32[32,16], index: 5, kind: input, shape index: {}]   ;;  %s588_s2 = inlined_call_operand.vmem [shape: f32[1,32], index: 2, kind: input, shape index: {}]   ;;  %s589_s4 = inlined_call_operand.vmem [shape: f32[1,32], index: 4, kind: input, shape index: {}]   ;;  %s590_s6 = inlined_call_operand.vmem [shape: f32[1,16], index: 6, kind: input, shape index: {}]   ;;  %s591_s7 = inlined_call_operand.vmem [shape: f32[32,16], index: 7, kind: output, shape index: {}]  }
   0x1   :  { %v30_v0 = vld [vmem:[%s584_s1] sm:$0xff]  ;;  %v31_v1 = vld [vmem:[%s584_s1 + $0x8] sm:$0xff]  ;;  %v28_v8 = vld [vmem:[%s585_s0 + $0x10] sm:$0xff] }
   0x2   :  { %v26_v2 = vld [vmem:[%s585_s0] sm:$0xff]  ;;  %v445_v3 = vpack.c.bf16 %v31_v1, %v30_v0  ;;  %v142_v5 = vld [vmem:[%s586_s3 + $0x8] sm:$0xff]  ;;  %v29_v9 = vld [vmem:[%s585_s0 + $0x18] sm:$0xff] }
   0x3   :  { %411 = vmatprep.mubr.msk.f32.mxu0 %vm39_vm0, %v26_v2  ;;  %v141_v4 = vld [vmem:[%s586_s3] sm:$0xff]  ;;  %v27_v7 = vld [vmem:[%s585_s0 + $0x8] sm:$0xff]  ;;  %v143_v10 = vld [vmem:[%s586_s3 + $0x10] sm:$0xff] }
   0x4   :  { %446 = vmatprep.subr.bf16.mxu0 %v445_v3  ;;  %v449_v6 = vpack.c.bf16 %v142_v5, %v141_v4  ;;  %v144_v11 = vld [vmem:[%s586_s3 + $0x18] sm:$0xff]  ;;  %v254_v13 = vld [vmem:[%s587_s5] sm:$0xff]  ;;  %v255_v14 = vld [vmem:[%s587_s5 + $0x8] sm:$0xff] }
   0x5   :  { %448 = vmatpush3.bf16.msra.mxu0 %v445_v3  ;;  %v453_v12 = vpack.c.bf16 %v144_v11, %v143_v10  ;;  %v457_v15 = vpack.c.bf16 %v255_v14, %v254_v13  ;;  %v370_v16 = vld [vmem:[%s588_s2] ss:$0 sm:$0xff]  ;;  %v256_v29 = vld [vmem:[%s587_s5 + $0x10] sm:$0xff]  ;;  %v257_v30 = vld [vmem:[%s587_s5 + $0x18] sm:$0xff] }
   0x6   :  { %450 = vmatprep.subr.bf16.mxu1 %v449_v6  ;;  %v461_v31 = vpack.c.bf16 %v257_v30, %v256_v29  ;;  %v375_v32 = vld [vmem:[%s589_s4] ss:$0 sm:$0xff] }
   0x7   :  { %452 = vmatpush3.bf16.msra.mxu1 %v449_v6  ;;  %458 = vmatprep.subr.bf16.mxu0 %v457_v15  ;;  %v380_v45 = vld [vmem:[%s590_s6] ss:$0 sm:$0xff] }
   0x8   :  { %412 = vmatmul.mubr.msk.f32.vlgmr.msra.gmra.mrb[0].mxu0 %vm39_vm0, %v27_v7  ;;  %454 = vmatprep.subr.bf16.mxu1 %v453_v12 }
   0x9   :  { %414 = vmatprep.mubr.msk.f32.mxu0 %vm39_vm0, %v28_v8  ;;  %460 = vmatpush3.bf16.msra.mxu0 %v457_v15 }
   0xa   :  { %462 = vmatprep.subr.bf16.mxu0 %v461_v31 }
   0xb   :  { %456 = vmatpush3.bf16.msra.mxu1 %v453_v12 }
   0xc   :  { %415 = vmatmul.mubr.msk.f32.gmra.mrb[2].mxu0 %vm39_vm0, %v29_v9 }
   0xd   :  { %464 = vmatpush3.bf16.msra.mxu0 %v461_v31 }
  0xdb   :  { %v413_v17 = vpop.f32.mrb[0].mxu0 }
  0xdc   :  { %v124_v18 = vadd.f32 %v413_v17, %v370_v16  ;;  %v118_v19 = vpop.f32.mrb[1].mxu0 }
  0xdd   :  { %v119_v20 = vadd.f32 %v370_v16, %v118_v19 }
  0xde   :  { %v138_v23 = vmax.f32 %v124_v18, 0.0 }
  0xdf   :  { %v137_v21 = vmax.f32 %v119_v20, 0.0  ;;  %v416_v22 = vpop.f32.mrb[2].mxu0 }
  0xe0   :  { %v134_v24 = vadd.f32 %v416_v22, %v370_v16  ;;  %v128_v25 = vpop.f32.mrb[3].mxu0 }
  0xe1   :  { %v129_v26 = vadd.f32 %v370_v16, %v128_v25  ;;  %425 = vmatprep.mubr.msk.f32.mxu1 %vm152_vm1, %v137_v21 }
  0xe2   :  { %426 = vmatmul.mubr.msk.f32.vlgmr.msra.gmra.mrb[0].mxu1 %vm152_vm1, %v138_v23  ;;  %v140_v28 = vmax.f32 %v134_v24, 0.0 }
  0xe3   :  { %v139_v27 = vmax.f32 %v129_v26, 0.0 }
  0xe5   :  { %428 = vmatprep.mubr.msk.f32.mxu1 %vm152_vm1, %v139_v27 }
  0xe6   :  { %429 = vmatmul.mubr.msk.f32.gmra.mrb[2].mxu1 %vm152_vm1, %v140_v28 }
 0x1b5   :  { %v427_v33 = vpop.f32.mrb[0].mxu1 }
 0x1b6   :  { %v237_v34 = vadd.f32 %v427_v33, %v375_v32  ;;  %v231_v35 = vpop.f32.mrb[1].mxu1 }
 0x1b7   :  { %v232_v36 = vadd.f32 %v375_v32, %v231_v35 }
 0x1b8   :  { %v251_v39 = vmax.f32 %v237_v34, 0.0 }
 0x1b9   :  { %v250_v37 = vmax.f32 %v232_v36, 0.0  ;;  %v430_v38 = vpop.f32.mrb[2].mxu1 }
 0x1ba   :  { %v247_v40 = vadd.f32 %v430_v38, %v375_v32  ;;  %v241_v41 = vpop.f32.mrb[3].mxu1 }
 0x1bb   :  { %v242_v42 = vadd.f32 %v375_v32, %v241_v41  ;;  %439 = vmatprep.mubr.msk.f32.mxu0 %vm152_vm1, %v250_v37 }
 0x1bc   :  { %440 = vmatmul.mubr.msk.f32.vlgmr.msra.gmra.mrb[4].mxu0 %vm152_vm1, %v251_v39  ;;  %v253_v44 = vmax.f32 %v247_v40, 0.0 }
 0x1bd   :  { %v252_v43 = vmax.f32 %v242_v42, 0.0 }
 0x1bf   :  { %442 = vmatprep.mubr.msk.f32.mxu0 %vm152_vm1, %v252_v43 }
 0x1c0   :  { %443 = vmatmul.mubr.msk.f32.gmra.mrb[6].mxu0 %vm152_vm1, %v253_v44 }
 0x28f   :  { %v441_v46 = vpop.f32.mrb[4].mxu0 }
 0x290   :  { %v349_v47 = vadd.f32 %v441_v46, %v380_v45  ;;  %v343_v48 = vpop.f32.mrb[5].mxu0 }
 0x291   :  { %v344_v49 = vadd.f32 %v380_v45, %v343_v48 }
 0x292   :  { %363 = vst.msk [vmem:[%s591_s7 + $0x8] sm:$0xff] %vm39_vm0, %v349_v47 }
 0x293   :  { %362 = vst.msk [vmem:[%s591_s7] sm:$0xff] %vm39_vm0, %v344_v49  ;;  %v444_v50 = vpop.f32.mrb[6].mxu0 }
 0x294   :  { %v359_v51 = vadd.f32 %v444_v50, %v380_v45  ;;  %v353_v52 = vpop.f32.mrb[7].mxu0 }
 0x295   :  { %v354_v53 = vadd.f32 %v380_v45, %v353_v52 }
 0x296   :  { %365 = vst.msk [vmem:[%s591_s7 + $0x18] sm:$0xff] %vm39_vm0, %v359_v51 }
 0x297   :  { %364 = vst.msk [vmem:[%s591_s7 + $0x10] sm:$0xff] %vm39_vm0, %v354_v53 }

</bundles_post_ra>
